<compile_context>
chip_gen: v6e
topology: v6e:2x2x1
jax: 0.10.0
libtpu: 0.0.40
codegen_flags: <defaults>
</compile_context>

<pallas_src>
import jax
import jax.numpy as jnp
from jax.experimental import pallas as pl
from jax.experimental.pallas import tpu as pltpu


def _interp_matrix(n_in: int, n_out: int) -> jnp.ndarray:
    """Row-stochastic (n_out, n_in) matrix implementing 1-D bilinear
    interpolation with align_corners=True (PyTorch semantics)."""
    o = jnp.arange(n_out, dtype=jnp.float32)
    if n_out == 1:
        src = jnp.zeros((1,), jnp.float32)
    else:
        src = o * (n_in - 1) / (n_out - 1)
    i0 = jnp.clip(jnp.floor(src).astype(jnp.int32), 0, n_in - 1)
    i1 = jnp.minimum(i0 + 1, n_in - 1)
    frac = src - i0.astype(jnp.float32)
    m0 = jax.nn.one_hot(i0, n_in, dtype=jnp.float32) * (1.0 - frac)[:, None]
    m1 = jax.nn.one_hot(i1, n_in, dtype=jnp.float32) * frac[:, None]
    return m0 + m1


def _choose_c_tile(C: int, H: int, W: int, budget_bytes: int = 6 * 1024 * 1024) -> int:
    """Largest output-channel tile that (a) divides C, (b) respects the (8,128)
    block constraint (tile == C or tile % 8 == 0), and (c) keeps the per-step
    intermediates (~19 * CT * H * W f32: conv out + width interp + upsampled +
    flattened store value + double-buffered output block) inside the budget."""
    per_ct = 19 * H * W * 4
    cands = [d for d in range(1, C + 1) if C % d == 0 and (d == C or d % 8 == 0)]
    fitting = [d for d in cands if d * per_ct <= budget_bytes]
    return max(fitting) if fitting else min(cands)


def _resample_kernel(x_ref, w_ref, rxT_ref, ry_ref, o_ref):
    # x_ref:   (C, H, W)        full input channels for this batch element
    # w_ref:   (CT, C)          slice of the 1x1-conv weight (output-channel tile)
    # rxT_ref: (W, Wo)          width  interpolation matrix, transposed
    # ry_ref:  (Ho, H)          height interpolation matrix
    # o_ref:   (CT, Ho*Wo)      lane-dense output slab (NCHW row-major order)
    C, H, W = x_ref.shape
    CT = w_ref.shape[0]
    Wo = rxT_ref.shape[1]
    Ho = ry_ref.shape[0]

    # (1) 1x1 conv hoisted before the upsample: one contraction over C.
    #     (CT, C) x (C, H, W) -> (CT, H, W)
    y = jnp.einsum('oc,chw->ohw', w_ref[...], x_ref[...],
                   preferred_element_type=jnp.float32)

    # (2) Width interpolation with channels folded into the matmul M dimension:
    #     a single (CT*H, W) @ (W, Wo) MXU matmul (leading-dim merge is free
    #     since H is a multiple of the sublane tile).
    s = jnp.dot(y.reshape(CT * H, W), rxT_ref[...],
                preferred_element_type=jnp.float32)          # (CT*H, Wo)

    # (3) Height interpolation: single contraction over H, producing the
    #     upsampled block directly in NCHW (c, u, v) order.
    up = jnp.einsum('chv,uh->cuv', s.reshape(CT, H, Wo), ry_ref[...],
                    preferred_element_type=jnp.float32)      # (CT, Ho, Wo)

    # (4) Lane-dense store: flatten (Ho, Wo) -> Ho*Wo (large multiple of 128).
    o_ref[...] = up.reshape(CT, Ho * Wo).astype(o_ref.dtype)


def resample_module(x: jnp.ndarray, conv_weight: jnp.ndarray,
                    *, c_tile: int | None = None,
                    vmem_limit_bytes: int = 64 * 1024 * 1024) -> jnp.ndarray:
    """x: (B, C, H, W) float32 NCHW.  conv_weight: (C, C) (from (C, C, 1, 1))."""
    B, C, H, W = x.shape
    Co, Ci = conv_weight.shape
    assert Ci == C and Co == C, (conv_weight.shape, C)
    Ho, Wo = 2 * H, 2 * W                       # F.interpolate(scale_factor=2.0)

    ry = _interp_matrix(H, Ho)                  # (Ho, H)
    rxT = _interp_matrix(W, Wo).T               # (W, Wo)

    if c_tile is None:
        c_tile = _choose_c_tile(C, H, W)
    assert C % c_tile == 0, (C, c_tile)
    n_ct = C // c_tile

    out_flat = pl.pallas_call(
        _resample_kernel,
        out_shape=jax.ShapeDtypeStruct((B, C, Ho * Wo), x.dtype),
        grid_spec=pltpu.PrefetchScalarGridSpec(
            num_scalar_prefetch=0,
            grid=(B, n_ct),                     # ct is the inner axis -> the x
                                                # block index is unchanged across it
            in_specs=[
                pl.BlockSpec((None, C, H, W), lambda b, ct: (b, 0, 0, 0)),
                pl.BlockSpec((c_tile, C), lambda b, ct: (ct, 0)),
                pl.BlockSpec((W, Wo), lambda b, ct: (0, 0)),
                pl.BlockSpec((Ho, H), lambda b, ct: (0, 0)),
            ],
            out_specs=pl.BlockSpec((None, c_tile, Ho * Wo),
                                   lambda b, ct: (b, ct, 0)),
        ),
        compiler_params=pltpu.CompilerParams(
            dimension_semantics=("parallel", "parallel"),
            vmem_limit_bytes=vmem_limit_bytes),
    )(x, conv_weight, rxT, ry)

    # Row-major (B, C, Ho*Wo) -> (B, C, Ho, Wo) is a free reshape (no transpose).
    return out_flat.reshape(B, C, Ho, Wo)


def _reference(x, conv_weight):
    """Pure-JAX reference in the ORIGINAL module order (upsample, then conv)."""
    B, C, H, W = x.shape
    ry = _interp_matrix(H, 2 * H)
    rx = _interp_matrix(W, 2 * W)
    up = jnp.einsum('bchw,uh,vw->bcuv', x, ry, rx)
    return jnp.einsum('oc,bcuv->bouv', conv_weight, up)


if __name__ == "__main__":
    key = jax.random.PRNGKey(0)
    k_x, k_w = jax.random.split(key)

    B, C, H, W = 2, 4, 16, 16
    x = jax.random.normal(k_x, (B, C, H, W), dtype=jnp.float32)

    # nn.Conv2d(C, C, kernel_size=1, bias=False) weight is (C, C, 1, 1);
    # squeeze the 1x1 spatial dims.
    conv_w_4d = jax.random.normal(k_w, (C, C, 1, 1), dtype=jnp.float32) * 0.1
    conv_w = conv_w_4d[:, :, 0, 0]              # (C_out, C_in)

    out = resample_module(x, conv_w)
    out = jax.block_until_ready(out)

    ref = _reference(x, conv_w)
    assert out.shape == (B, C, 2 * H, 2 * W), out.shape
    assert jnp.allclose(out, ref, atol=1e-4, rtol=1e-3), "mismatch vs reference"

    print("KERNEL_OK")
</pallas_src>

<mosaic_0001>
module attributes {stable_mosaic.version = 11 : i64} {
  func.func @_resample_kernel(%arg0: i32, %arg1: i32, %arg2: memref<1x4x16x16xf32, #tpu.memory_space<vmem>>, %arg3: memref<4x4xf32, #tpu.memory_space<vmem>>, %arg4: memref<16x32xf32, #tpu.memory_space<vmem>>, %arg5: memref<32x16xf32, #tpu.memory_space<vmem>>, %arg6: memref<1x4x1024xf32, #tpu.memory_space<vmem>>) attributes {dimension_semantics = [#tpu.dimension_semantics<parallel>, #tpu.dimension_semantics<parallel>], iteration_bounds = array<i64: 2, 1>, scalar_prefetch = 0 : i64, scratch_operands = 0 : i64, tpu.core_type = #tpu.core_type<tc>, window_params = [{transform_indices = @transform_0, window_bounds = array<i64: 1, 4, 16, 16>}, {transform_indices = @transform_1, window_bounds = array<i64: 4, 4>}, {pipeline_mode = #tpu.pipeline_mode<synchronous>, transform_indices = @transform_2, window_bounds = array<i64: 16, 32>}, {pipeline_mode = #tpu.pipeline_mode<synchronous>, transform_indices = @transform_3, window_bounds = array<i64: 32, 16>}, {transform_indices = @transform_4, window_bounds = array<i64: 1, 4, 1024>}]} {
    %c0 = arith.constant 0 : index
    %c0_0 = arith.constant 0 : index
    %0 = vector.load %arg3[%c0, %c0_0] : memref<4x4xf32, #tpu.memory_space<vmem>>, vector<4x4xf32>
    %c0_1 = arith.constant 0 : index
    %c0_2 = arith.constant 0 : index
    %c0_3 = arith.constant 0 : index
    %c0_4 = arith.constant 0 : index
    %1 = vector.load %arg2[%c0_1, %c0_2, %c0_3, %c0_4] : memref<1x4x16x16xf32, #tpu.memory_space<vmem>>, vector<1x4x16x16xf32>
    %2 = vector.shape_cast %1 : vector<1x4x16x16xf32> to vector<4x16x16xf32>
    "tpu.trace_start"() <{level = 10 : i32, message = "oc,chw->ohw"}> : () -> ()
    %cst = arith.constant dense<0.000000e+00> : vector<4x16x16xf32>
    %3 = tpu.matmul %0, %2, %cst {dimension_numbers = #tpu.dot_dimension_numbers<[1], [0], [0], [1, 2], [0, 0, 1, 1, 1, 2], [], []>} : vector<4x4xf32>, vector<4x16x16xf32>, vector<4x16x16xf32> -> vector<4x16x16xf32>
    "tpu.trace_stop"() : () -> ()
    %4 = vector.shape_cast %3 : vector<4x16x16xf32> to vector<64x16xf32>
    %c0_5 = arith.constant 0 : index
    %c0_6 = arith.constant 0 : index
    %5 = vector.load %arg4[%c0_5, %c0_6] : memref<16x32xf32, #tpu.memory_space<vmem>>, vector<16x32xf32>
    %cst_7 = arith.constant dense<0.000000e+00> : vector<64x32xf32>
    %6 = tpu.matmul %4, %5, %cst_7 {dimension_numbers = #tpu.dot_dimension_numbers<[1], [0], [0], [1], [0, 0, 1, 1], [], []>} : vector<64x16xf32>, vector<16x32xf32>, vector<64x32xf32> -> vector<64x32xf32>
    %7 = vector.shape_cast %6 : vector<64x32xf32> to vector<4x16x32xf32>
    %c0_8 = arith.constant 0 : index
    %c0_9 = arith.constant 0 : index
    %8 = vector.load %arg5[%c0_8, %c0_9] : memref<32x16xf32, #tpu.memory_space<vmem>>, vector<32x16xf32>
    "tpu.trace_start"() <{level = 10 : i32, message = "chv,uh->cuv"}> : () -> ()
    %cst_10 = arith.constant dense<0.000000e+00> : vector<32x4x32xf32>
    %9 = tpu.matmul %8, %7, %cst_10 {dimension_numbers = #tpu.dot_dimension_numbers<[1], [1], [0], [0, 2], [0, 0, 1, 0, 1, 2], [], []>} : vector<32x16xf32>, vector<4x16x32xf32>, vector<32x4x32xf32> -> vector<32x4x32xf32>
    %10 = tpu.transpose %9, [1, 0, 2] : vector<32x4x32xf32> -> vector<4x32x32xf32>
    "tpu.trace_stop"() : () -> ()
    %11 = vector.shape_cast %10 : vector<4x32x32xf32> to vector<4x1024xf32>
    %c0_11 = arith.constant 0 : index
    %c0_12 = arith.constant 0 : index
    %c0_13 = arith.constant 0 : index
    %12 = vector.load %arg6[%c0_11, %c0_12, %c0_13] : memref<1x4x1024xf32, #tpu.memory_space<vmem>>, vector<1x4x1024xf32>
    %13 = vector.shape_cast %12 : vector<1x4x1024xf32> to vector<4x1024xf32>
    %14 = vector.shape_cast %11 : vector<4x1024xf32> to vector<1x4x1024xf32>
    tpu.vector_store %arg6[%c0_11, %c0_12, %c0_13], %14 {strides = array<i32>} : memref<1x4x1024xf32, #tpu.memory_space<vmem>>, vector<1x4x1024xf32>,
    return
  }
  func.func @transform_0(%arg0: i32, %arg1: i32) -> (i32, i32, i32, i32) {
    %c0_i32 = arith.constant 0 : i32
    %c0_i32_0 = arith.constant 0 : i32
    %c0_i32_1 = arith.constant 0 : i32
    %c0_i32_2 = arith.constant 0 : i32
    return %arg0, %c0_i32, %c0_i32_0, %c0_i32_1 : i32, i32, i32, i32
  }
  func.func @transform_1(%arg0: i32, %arg1: i32) -> (i32, i32) {
    %c0_i32 = arith.constant 0 : i32
    %c0_i32_0 = arith.constant 0 : i32
    return %arg1, %c0_i32 : i32, i32
  }
  func.func @transform_2(%arg0: i32, %arg1: i32) -> (i32, i32) {
    %c0_i32 = arith.constant 0 : i32
    %c0_i32_0 = arith.constant 0 : i32
    %c0_i32_1 = arith.constant 0 : i32
    return %c0_i32, %c0_i32_0 : i32, i32
  }
  func.func @transform_3(%arg0: i32, %arg1: i32) -> (i32, i32) {
    %c0_i32 = arith.constant 0 : i32
    %c0_i32_0 = arith.constant 0 : i32
    %c0_i32_1 = arith.constant 0 : i32
    return %c0_i32, %c0_i32_0 : i32, i32
  }
  func.func @transform_4(%arg0: i32, %arg1: i32) -> (i32, i32, i32) {
    %c0_i32 = arith.constant 0 : i32
    %c0_i32_0 = arith.constant 0 : i32
    return %arg0, %arg1, %c0_i32 : i32, i32, i32
  }
}

</mosaic_0001>

<bundles_post_ra>
// kernel: tpu_custom_call.1
= control target key start
LH: loop header
LB: loop body
LE: loop exit
PB: predicated region body
PF: predicated region fallthrough
CT: control target
= control target key end

     0   :  { %9 = vsyncpa [#allocation3], 0  ;;  %s3394_s0 = inlined_call_operand.hbm [shape: f32[2,4,16,16], index: 0, kind: input, shape index: {}]   ;;  %s3395_s1 = inlined_call_operand.vmem [shape: f32[4,4], index: 1, kind: input, shape index: {}]   ;;  %s3396_s2 = inlined_call_operand.vmem [shape: f32[16,32], index: 2, kind: input, shape index: {}]   ;;  %s3397_s3 = inlined_call_operand.vmem [shape: f32[32,16], index: 3, kind: input, shape index: {}]   ;;  %s3398_s4 = inlined_call_operand.hbm [shape: f32[2,4,1024], index: 4, kind: output, shape index: {}]  }
   0x1   :  { %11 = vsyncpa [#allocation3 + $0x1], 0 }
   0x2   :  { %12 = vsyncpa [#allocation4], 0 }
   0x3   :  { %14 = vsyncpa [#allocation4 + $0x1], 0  ;;  %s2806_s15 = smov 0   ;;  %s2808_s16 = smov 0  }
   0x4   :  { %s2810_s17 = smov 0   ;;  %s2812_s18 = smov 0  }
   0x5   :  { %s2814_s19 = smov 0   ;;  %s2816_s20 = smov 0  }
   0x6 LB: > { %s2480_s21 = sadd.s32 4294967295, %s2765_s20   ;;  %s2481_s22 = sadd.s32 4294967294, %s2765_s20   ;;  %s2765_s20 = sphi %s2816_s20, %s20_s20   ;;  %s2761_s19 = sphi %s2814_s19, %s3409_s19   ;;  %s2757_s18 = sphi %s2812_s18, %s3408_s18   ;;  %s2753_s17 = sphi %s2810_s17, %s3407_s17   ;;  %s2749_s16 = sphi %s2808_s16, %s3406_s16   ;;  %s2745_s15 = sphi %s2806_s15, %s3405_s15  }
   0x7   : > { %s32_s23 = sadd.s32 1, %s2761_s19  ;;  %s39_s24 = sadd.s32 1, %s2753_s17 }
   0x8   : > { %p34_p0 = scmp.ge.s32.totalorder %s32_s23, 2  ;;  %p46_p1 = scmp.ne.s32.totalorder %s2753_s17, %s2749_s16 }
   0x9   : > { %p47_p2 = scmp.eq.s32.totalorder %s2765_s20, 0  ;;  %p52_p3 = scmp.ne.s32.totalorder %s2749_s16, %s2745_s15 }
   0xa   : > { %s3411_s23 = smov (%p34_p0, %s32_s23), 0  ;;  %p53_p5 = scmp.eq.s32.totalorder %s2480_s21, 0 }
   0xb   : > { %p2847_p4 = por %p47_p2, %p46_p1  ;;  %s36_s26 = ssub.s32 %s2761_s19, %s3411_s23 }
   0xc   : > { %p146_p6 = scmp.eq.s32.totalorder %s2480_s21, 1  ;;  %p37_p7 = scmp.eq.s32.totalorder %s36_s26, 0 }
   0xd   : > { %p2853_p8 = por %p53_p5, %p52_p3  ;;  %p152_p10 = scmp.eq.s32.totalorder %s2481_s22, 1 }
   0xe   : > { %p2857_p9 = por %p146_p6, %p46_p1  ;;  %p2595_p13 = scmp.lt.s32.totalorder %s2765_s20, 2 }
   0xf   : > { %s2862_s29 = scalar_select %p37_p7, %s2753_s17, %s39_s24  }
  0x10   : > { %p2864_p11 = por %p152_p10, %p52_p3  ;;  %s185_s5 = sand.u32 1, %s2753_s17  }
  0x11   : > { %s2485_s6 = sshll.u32 %s185_s5, 6  ;;  %s2539_s7 = sshll.u32 %s2761_s19, 10 }
  0x12   : > { %s195_s10 = scalar_lea.hbm %s3394_s0, %s2539_s7  ;;  %s189_s11 = scalar_lea.vmem [#allocation2], %s2485_s6 }
  0x13   : > { %s196_s12 = sshll.u32 %s189_s11, 4  ;;  %p2877_p0 = pnand %p2595_p13, %p2847_p4  ;;  %s197_s12 = int_to_ptr.vmem [resolvable:$true] %s196_s12 }
  0x14   : > { %p2488_p1 = scmp.ge.s32.totalorder %s2765_s20, 1  ;;  %s186_s14 = scalar_lea.sflag [#allocation3], %s185_s5 }
  0x15   : > { %p2659_p2 = pneg %p2877_p0  ;;  %s2670_s21 = scalar_lea.vmem %s197_s12, 1024 }
  0x16   : > { %p2671_p3 = scmp.ne.s32.totalorder %s197_s12, %s2670_s21  ;;  %s2767_s22 = smov [#allocation2]  }
  0x17   : > { %s2675_s24 = sshll.u32 %s2767_s22, 4  ;;  %s2676_s24 = int_to_ptr.vmem [resolvable:$false] %s2675_s24 }
  0x18   : > { %p2673_p5 = pnand %p2671_p3, %p2659_p2  ;;  %s2677_s26 = scalar_lea.vmem %s2676_s24, 2048 }
  0x19   : > { %p2678_p7 = scmp.lt.s32.totalorder %s197_s12, %s2676_s24  ;;  %p2679_p10 = scmp.lt.s32.totalorder %s2677_s26, %s2670_s21 }
  0x1a   : > { %p2674_p6 = pneg %p2673_p5 }
  0x1b   : > { %p2680_p12 = por %p2679_p10, %p2678_p7 }
  0x1d   : > { %p2681_p4 = pnand %p2680_p12, %p2674_p6 }
  0x1f   : > { %2684 = shalt.err (!%p2681_p4)
}
  0x20   : > { %s2768_s25 = smov 128   ;;  %s2769_s5 = smov 8  }
  0x21   : > { %2590 = dma.hbm_to_vmem [thread:$0]  (!%p2877_p0), %s195_s10, 1024, %s197_s12, %s186_s14, %s2768_s25, %s2768_s25, %s2769_s5  }
  0x22   : > { %p204_p13 = scmp.lt.s32.totalorder %s2765_s20, 3 }
  0x24   : > { %p205_p2 = pnand %p2488_p1, %p204_p13 }
  0x25   : > { %s2890_s6 = sand.u32 (!%p205_p2), 1, %s2749_s16  }
  0x26   : > { %208 = sbr.rel (%p205_p2) target bundleno = 1421 (0x58d), region = 36  ;;  %s2489_s7 = sshll.u32 (!%p205_p2), %s2890_s6, 6 }
  0x27   : > { %s211_s8 = scalar_lea.sflag (!%p205_p2), [#allocation3], %s2890_s6  ;;  %s214_s9 = scalar_lea.vmem (!%p205_p2), [#allocation2], %s2489_s7 }
  0x2b   : > { %2736 = dma.done.wait (%p2853_p8), %s211_s8, 1024  }
  0x2c   : > { %2738 = vsyncadd (%p2853_p8), %s211_s8, 4294966272  ;;  %v261_v0 = vlaneseq  ;;  %v2770_v1 = vmov 1983009808   ;;  %v2771_v3 = vmov 1934713408   ;;  %v2772_v5 = vmov 0.0  }
  0x2d   : > { %v259_v2 = vunpack.c.l.s4 %v2770_v1  ;;  %v291_v4 = vunpack.c.l.s4 %v2771_v3  ;;  %631 = vmatprep.mubr.f32.mxu0 %v2772_v5  ;;  %v249_v10 = vld [vmem:[%s214_s9 + $0x8] sm:$0xff]  ;;  %v251_v11 = vld [vmem:[%s214_s9 + $0x18] sm:$0xff]  ;;  %v248_v16 = vld [vmem:[%s214_s9] sm:$0xff]  ;;  %s2773_s27 = smov 64   ;;  %s2774_s10 = smov 32   ;;  %v469_v55 = vcombine.low %v2772_v5, %v2772_v5  ;;  %v470_v59 = vcombine.high %v2772_v5, %v2772_v5 }
  0x2e   : > { %v262_v6 = vshrl.u32 %v261_v0, 7  ;;  %v253_v12 = vld [vmem:[%s214_s9 + $0x28] sm:$0xff]  ;;  %v255_v13 = vld [vmem:[%s214_s9 + $0x38] sm:$0xff]  ;;  %v250_v17 = vld [vmem:[%s214_s9 + $0x10] sm:$0xff]  ;;  %s2775_s11 = smov 16   ;;  %s2776_s12 = smov 48  }
  0x2f   : > { %v260_v7 = vunpack.c.0.s8 %v259_v2  ;;  %v292_v8 = vunpack.c.0.s8 %v291_v4  ;;  %v325_v14 = vcombine.high %v249_v10, %v253_v12  ;;  %v324_v15 = vcombine.low %v249_v10, %v253_v12  ;;  %v252_v21 = vld [vmem:[%s214_s9 + $0x20] sm:$0xff]  ;;  %v254_v22 = vld [vmem:[%s214_s9 + $0x30] sm:$0xff]  ;;  %s2777_s13 = smov 80   ;;  %s2778_s14 = smov 96  }
  0x30   : > { %v341_v19 = vcombine.high %v251_v11, %v255_v13  ;;  %v340_v20 = vcombine.low %v251_v11, %v255_v13  ;;  %v256_v25 = vcombine.low %v248_v16, %v252_v21  ;;  %v272_v26 = vcombine.low %v250_v17, %v254_v22  ;;  %s2779_s21 = smov 112   ;;  %s2780_s9 = smov [#allocation5]  }
  0x31   : > { %v2899_v9 = vsub.s32 %v260_v7, %v262_v6  ;;  %v2901_v18 = vsub.s32 %v292_v8, %v262_v6  ;;  %v257_v29 = vcombine.high %v248_v16, %v252_v21  ;;  %v273_v30 = vcombine.high %v250_v17, %v254_v22 }
  0x32   : > { %vm448_vm0 = vcmask 130048   ;;  %vm450_vm1 = vcmask 261120   ;;  %vm452_vm2 = vcmask 392192   ;;  %vm454_vm3 = vcmask 523264  }
  0x33   : > { %v339_v23 = vrot.slane %v325_v14, %v2899_v9  ;;  %v332_v24 = vrot.slane %v324_v15, %v2899_v9  ;;  %v355_v27 = vrot.slane %v341_v19, %v2899_v9  ;;  %v348_v28 = vrot.slane %v340_v20, %v2899_v9 }
  0x34   : > { %v264_v31 = vrot.slane %v256_v25, %v2899_v9  ;;  %v280_v32 = vrot.slane %v272_v26, %v2899_v9  ;;  %v271_v36 = vrot.slane %v257_v29, %v2899_v9  ;;  %v287_v38 = vrot.slane %v273_v30, %v2899_v9 }
  0x35   : > { %v372_v33 = vcombine.low %v339_v23, %v355_v27  ;;  %v357_v34 = vcombine.high %v332_v24, %v348_v28  ;;  %v356_v35 = vcombine.low %v332_v24, %v348_v28  ;;  %v373_v54 = vcombine.high %v339_v23, %v355_v27 }
  0x36   : > { %v289_v37 = vcombine.high %v264_v31, %v280_v32  ;;  %v288_v39 = vcombine.low %v264_v31, %v280_v32  ;;  %v304_v45 = vcombine.low %v271_v36, %v287_v38  ;;  %v305_v51 = vcombine.high %v271_v36, %v287_v38 }
  0x37   : > { %v380_v40 = vrot.slane %v372_v33, %v2901_v18  ;;  %v371_v41 = vrot.slane %v357_v34, %v2901_v18  ;;  %v2914_v42 = vrot.slane %v356_v35, %v2901_v18  ;;  %v387_v57 = vrot.slane %v373_v54, %v2901_v18 }
  0x38   : > { %v303_v43 = vrot.slane %v289_v37, %v2901_v18  ;;  %v2922_v46 = vrot.slane %v288_v39, %v2901_v18  ;;  %v312_v47 = vrot.slane %v304_v45, %v2901_v18  ;;  %v319_v56 = vrot.slane %v305_v51, %v2901_v18 }
  0x39   : > { %433 = vrot.lane.b32.xlu0 %v380_v40, %s2773_s27  ;;  %425 = vrot.lane.b32.xlu1 %v371_v41, %s2774_s10  ;;  %v388_v44 = vcombine.high %v2914_v42, %v2772_v5  ;;  %v389_v49 = vcombine.high %v371_v41, %v2772_v5  ;;  %v390_v52 = vcombine.high %v380_v40, %v2772_v5  ;;  %vm456_vm4 = vcmask 654336  }
  0x3a   : > { %v320_v48 = vcombine.high %v2922_v46, %v2772_v5  ;;  %v321_v50 = vcombine.high %v303_v43, %v2772_v5  ;;  %v322_v53 = vcombine.high %v312_v47, %v2772_v5  ;;  %v477_v58 = vrot.slane %v469_v55, %v2899_v9 }
  0x3b   : > { %v323_v61 = vcombine.high %v319_v56, %v2772_v5  ;;  %v391_v62 = vcombine.high %v387_v57, %v2772_v5  ;;  %v484_v1 = vrot.slane %v470_v59, %v2899_v9  ;;  %vm458_vm5 = vcmask 785408  }
  0x3c   : > { %v485_v60 = vcombine.low %v477_v58, %v477_v58  ;;  %v486_v0 = vcombine.high %v477_v58, %v477_v58  ;;  %vm460_vm6 = vcmask 916480   ;;  %vm560_vm7 = vcmask 1043456  }
  0x3d   : > { %421 = vrot.lane.b32.xlu0 %v388_v44, %s2775_s11  ;;  %397 = vrot.lane.b32.xlu1 %v303_v43, %s2774_s10  ;;  %v501_v4 = vcombine.low %v484_v1, %v484_v1  ;;  %v502_v8 = vcombine.high %v484_v1, %v484_v1  ;;  %vm556_vm8 = vcmask 31744  }
  0x3e   : > { %v2951_v63 = vrot.slane %v485_v60, %v2901_v18  ;;  %v2959_v3 = vrot.slane %v486_v0, %v2901_v18 }
  0x3f   : > { %v509_v7 = vrot.slane %v501_v4, %v2901_v18  ;;  %v516_v11 = vrot.slane %v502_v8, %v2901_v18 }
  0x40   : > { %v517_v2 = vcombine.high %v2951_v63, %v2772_v5  ;;  %v518_v6 = vcombine.high %v2959_v3, %v2772_v5 }
  0x41   : > { %405 = vrot.lane.b32.xlu1 %v312_v47, %s2773_s27  ;;  %393 = vrot.lane.b32.xlu0 %v320_v48, %s2775_s11  ;;  %v519_v10 = vcombine.high %v509_v7, %v2772_v5  ;;  %v520_v12 = vcombine.high %v516_v11, %v2772_v5 }
  0x45   : > { %401 = vrot.lane.b32.xlu1 %v321_v50, %s2776_s12  ;;  %429 = vrot.lane.b32.xlu0 %v389_v49, %s2776_s12 }
  0x49   : > { %409 = vrot.lane.b32.xlu1 %v322_v53, %s2777_s13  ;;  %437 = vrot.lane.b32.xlu0 %v390_v52, %s2777_s13 }
  0x4d   : > { %413 = vrot.lane.b32.xlu1 %v319_v56, %s2778_s14  ;;  %441 = vrot.lane.b32.xlu0 %v387_v57, %s2778_s14 }
  0x51   : > { %417 = vrot.lane.b32.xlu1 %v323_v61, %s2779_s21  ;;  %445 = vrot.lane.b32.xlu0 %v391_v62, %s2779_s21  ;;  %v819_v61 = vld [vmem:[%s3396_s2 + $0x8] sm:$0xff]  ;;  %v818_v62 = vld [vmem:[%s3396_s2] sm:$0xff] }
  0x52   : > { %2557 = vmatprep.subr.mxu1 %v819_v61 }
  0x53   : > { %2558 = vmatpush3.msra.mxu1 %v819_v61 }
  0x54   : > { %2559 = vmatprep.subr.mxu1 %v818_v62 }
  0x55   : > { %522 = vrot.lane.b32.xlu0 %v517_v2, %s2775_s11  ;;  %526 = vrot.lane.b32.xlu1 %v2959_v3, %s2774_s10 }
  0x56   : > { %2560 = vmatpush3.msra.mxu1 %v818_v62 }
  0x59   : > { %530 = vrot.lane.b32.xlu0 %v518_v6, %s2776_s12  ;;  %534 = vrot.lane.b32.xlu1 %v509_v7, %s2773_s27 }
  0x5d   : > { %538 = vrot.lane.b32.xlu0 %v519_v10, %s2777_s13  ;;  %542 = vrot.lane.b32.xlu1 %v516_v11, %s2778_s14 }
  0x61   : > { %546 = vrot.lane.b32.xlu0 %v520_v12, %s2779_s21 }
  0xab   : > { %v434_v13 = vpop.permute.xlu0 %433  ;;  %v426_v14 = vpop.permute.xlu1 %425 }
  0xaf   : > { %v422_v15 = vpop.permute.xlu0 %421  ;;  %v398_v16 = vpop.permute.xlu1 %397 }
  0xb0   : > { %v462_v22 = vsel %vm448_vm0, %v2914_v42, %v422_v15  ;;  %v247_v42 = vld [vmem:[%s3395_s1] sm:$0xf] }
  0xb1   : > { %v463_v27 = vsel %vm450_vm1, %v462_v22, %v426_v14 }
  0xb3   : > { %v406_v17 = vpop.permute.xlu1 %405  ;;  %v394_v19 = vpop.permute.xlu0 %393 }
  0xb4   : > { %v449_v23 = vsel %vm448_vm0, %v2922_v46, %v394_v19 }
  0xb5   : > { %v451_v26 = vsel %vm450_vm1, %v449_v23, %v398_v16 }
  0xb7   : > { %v402_v20 = vpop.permute.xlu1 %401  ;;  %v430_v21 = vpop.permute.xlu0 %429 }
  0xb8   : > { %v453_v28 = vsel %vm452_vm2, %v451_v26, %v402_v20  ;;  %v464_v29 = vsel %vm452_vm2, %v463_v27, %v430_v21 }
  0xb9   : > { %v455_v32 = vsel %vm454_vm3, %v453_v28, %v406_v17  ;;  %v465_v33 = vsel %vm454_vm3, %v464_v29, %v434_v13 }
  0xbb   : > { %v410_v24 = vpop.permute.xlu1 %409  ;;  %v438_v25 = vpop.permute.xlu0 %437 }
  0xbc   : > { %v457_v34 = vsel %vm456_vm4, %v455_v32, %v410_v24  ;;  %v466_v35 = vsel %vm456_vm4, %v465_v33, %v438_v25 }
  0xbf   : > { %v414_v30 = vpop.permute.xlu1 %413  ;;  %v442_v31 = vpop.permute.xlu0 %441 }
  0xc0   : > { %v459_v36 = vsel %vm458_vm5, %v457_v34, %v414_v30  ;;  %v467_v37 = vsel %vm458_vm5, %v466_v35, %v442_v31 }
  0xc3   : > { %v418_v38 = vpop.permute.xlu1 %417  ;;  %v446_v39 = vpop.permute.xlu0 %445 }
  0xc4   : > { %v468_v40 = vsel %vm460_vm6, %v467_v37, %v446_v39  ;;  %v461_v41 = vsel %vm460_vm6, %v459_v36, %v418_v38 }
  0xc5   : > { %2491 = vmatprep.subr.msk.mxu0 %vm560_vm7, %v468_v40 }
  0xc6   : > { %2492 = vmatpush1.msk.msra.mxu0 %vm560_vm7, %v461_v41 }
  0xc7   : > { %2493 = vmatmul.mubr.msk.f32.vlgmr.msra.gmra.mxu0 %vm556_vm8, %v247_v42  ;;  %v523_v43 = vpop.permute.xlu0 %522  ;;  %v527_v44 = vpop.permute.xlu1 %526 }
  0xc8   : > { %v549_v45 = vsel %vm448_vm0, %v2951_v63, %v523_v43 }
  0xc9   : > { %v550_v46 = vsel %vm450_vm1, %v549_v45, %v527_v44 }
  0xcb   : > { %v531_v47 = vpop.permute.xlu0 %530  ;;  %v535_v48 = vpop.permute.xlu1 %534 }
  0xcc   : > { %v551_v49 = vsel %vm452_vm2, %v550_v46, %v531_v47 }
  0xcd   : > { %v552_v50 = vsel %vm454_vm3, %v551_v49, %v535_v48 }
  0xcf   : > { %v539_v51 = vpop.permute.xlu0 %538  ;;  %v543_v52 = vpop.permute.xlu1 %542 }
  0xd0   : > { %v553_v53 = vsel %vm456_vm4, %v552_v50, %v539_v51 }
  0xd1   : > { %v554_v54 = vsel %vm458_vm5, %v553_v53, %v543_v52 }
  0xd3   : > { %v547_v55 = vpop.permute.xlu0 %546 }
  0xd4   : > { %v555_v56 = vsel %vm460_vm6, %v554_v54, %v547_v55 }
 0x187   : > { %v633_v57 = vpop.f32.mrf.mxu0 }
 0x188   : > { %v634_v58 = vadd.f32 %v633_v57, %v555_v56 }
 0x189   : > { %v635_v59 = vpop.f32.mrf.mxu0 }
 0x18a   : > { %642 = vrot.lane.b32.xlu0 %v634_v58, %s2778_s14  ;;  %639 = vrot.lane.b32.xlu1 %v634_v58, %s2779_s21  ;;  %v636_v60 = vadd.f32 %v635_v59, %v555_v56 }
 0x18e   : > { %648 = vrot.lane.b32.xlu0 %v634_v58, %s2773_s27  ;;  %645 = vrot.lane.b32.xlu1 %v634_v58, %s2777_s13 }
 0x192   : > { %654 = vrot.lane.b32.xlu0 %v634_v58, %s2774_s10  ;;  %651 = vrot.lane.b32.xlu1 %v634_v58, %s2776_s12 }
 0x196   : > { %661 = vrot.lane.b32.xlu0 %v636_v60, %s2779_s21  ;;  %657 = vrot.lane.b32.xlu1 %v634_v58, %s2775_s11 }
 0x19a   : > { %667 = vrot.lane.b32.xlu0 %v636_v60, %s2777_s13  ;;  %664 = vrot.lane.b32.xlu1 %v636_v60, %s2778_s14 }
 0x19e   : > { %673 = vrot.lane.b32.xlu0 %v636_v60, %s2776_s12  ;;  %670 = vrot.lane.b32.xlu1 %v636_v60, %s2773_s27 }
 0x1a2   : > { %679 = vrot.lane.b32.xlu0 %v636_v60, %s2775_s11  ;;  %676 = vrot.lane.b32.xlu1 %v636_v60, %s2774_s10  ;;  %s2689_s11 = sshll.u32 %s2780_s9, 4  ;;  %s2690_s11 = int_to_ptr.vmem [resolvable:$false] %s2689_s11 }
 0x1a3   : > { %s2691_s12 = scalar_lea.vmem %s2690_s11, 1024 }
 0x1fc   : > { %v643_v0 = vpop.permute.xlu0 %642  ;;  %v640_v1 = vpop.permute.xlu1 %639 }
 0x1fd   : > { %v682_v10 = vcombine.low %v634_v58, %v643_v0 }
 0x1ff   : > { %v689_v15 = vrot.slane %v682_v10, %v2899_v9 }
 0x200   : > { %v649_v2 = vpop.permute.xlu0 %648  ;;  %v646_v4 = vpop.permute.xlu1 %645 }
 0x201   : > { %v690_v6 = vcombine.low %v640_v1, %v646_v4 }
 0x203   : > { %v697_v11 = vrot.slane %v690_v6, %v2899_v9 }
 0x204   : > { %v655_v7 = vpop.permute.xlu0 %654  ;;  %v652_v8 = vpop.permute.xlu1 %651 }
 0x205   : > { %v698_v12 = vcombine.low %v649_v2, %v655_v7  ;;  %v714_v17 = vcombine.low %v689_v15, %v697_v11  ;;  %v715_v44 = vcombine.high %v689_v15, %v697_v11 }
 0x207   : > { %v705_v19 = vrot.slane %v698_v12, %v2899_v9  ;;  %v722_v26 = vrot.slane %v714_v17, %v2901_v18  ;;  %v729_v50 = vrot.slane %v715_v44, %v2901_v18 }
 0x208   : > { %v662_v13 = vpop.permute.xlu0 %661  ;;  %v658_v14 = vpop.permute.xlu1 %657 }
 0x209   : > { %v706_v16 = vcombine.low %v652_v8, %v658_v14 }
 0x20b   : > { %v713_v20 = vrot.slane %v706_v16, %v2899_v9 }
 0x20c   : > { %v668_v21 = vpop.permute.xlu0 %667  ;;  %v665_v22 = vpop.permute.xlu1 %664 }
 0x20d   : > { %v730_v23 = vcombine.low %v705_v19, %v713_v20  ;;  %v758_v24 = vcombine.low %v662_v13, %v668_v21  ;;  %v750_v25 = vcombine.low %v636_v60, %v665_v22  ;;  %v731_v41 = vcombine.high %v705_v19, %v713_v20 }
 0x20f   : > { %v738_v27 = vrot.slane %v730_v23, %v2901_v18  ;;  %v765_v31 = vrot.slane %v758_v24, %v2899_v9  ;;  %v757_v32 = vrot.slane %v750_v25, %v2899_v9  ;;  %v745_v47 = vrot.slane %v731_v41, %v2901_v18 }
 0x210   : > { %v674_v28 = vpop.permute.xlu0 %673  ;;  %v671_v29 = vpop.permute.xlu1 %670 }
 0x211   : > { %v746_v30 = vcombine.low %v722_v26, %v738_v27  ;;  %v782_v37 = vcombine.low %v757_v32, %v765_v31  ;;  %v747_v48 = vcombine.high %v722_v26, %v738_v27  ;;  %v783_v49 = vcombine.high %v757_v32, %v765_v31 }
 0x212   : > { %v748_v53 = vcombine.low %v729_v50, %v745_v47  ;;  %v749_v56 = vcombine.high %v729_v50, %v745_v47 }
 0x213   : > { %2561 = vmatprep.mubr.msk.f32.mxu1 %vm448_vm0, %v746_v30  ;;  %v790_v42 = vrot.slane %v782_v37, %v2901_v18  ;;  %v797_v54 = vrot.slane %v783_v49, %v2901_v18 }
 0x214   : > { %v680_v33 = vpop.permute.xlu0 %679  ;;  %v677_v34 = vpop.permute.xlu1 %676 }
 0x215   : > { %v774_v35 = vcombine.low %v674_v28, %v680_v33  ;;  %v766_v36 = vcombine.low %v671_v29, %v677_v34 }
 0x217   : > { %v781_v38 = vrot.slane %v774_v35, %v2899_v9  ;;  %v773_v39 = vrot.slane %v766_v36, %v2899_v9 }
 0x219   : > { %v798_v40 = vcombine.low %v773_v39, %v781_v38  ;;  %v799_v45 = vcombine.high %v773_v39, %v781_v38 }
 0x21b   : > { %v806_v43 = vrot.slane %v798_v40, %v2901_v18  ;;  %v813_v51 = vrot.slane %v799_v45, %v2901_v18 }
 0x21d   : > { %v814_v46 = vcombine.low %v790_v42, %v806_v43  ;;  %v815_v52 = vcombine.high %v790_v42, %v806_v43  ;;  %v816_v55 = vcombine.low %v797_v54, %v813_v51  ;;  %v817_v57 = vcombine.high %v797_v54, %v813_v51 }
 0x21f   : > { %2562 = vmatmul.mubr.msk.f32.vlgmr.msra.gmra.mxu1 %vm448_vm0, %v814_v46 }
 0x220   : > { %2564 = vmatprep.mubr.msk.f32.mxu1 %vm448_vm0, %v747_v48 }
 0x223   : > { %2565 = vmatmul.mubr.msk.f32.gmra.mxu1 %vm448_vm0, %v815_v52 }
 0x224   : > { %2567 = vmatprep.mubr.msk.f32.mxu1 %vm448_vm0, %v748_v53 }
 0x227   : > { %2568 = vmatmul.mubr.msk.f32.gmra.mxu1 %vm448_vm0, %v816_v55 }
 0x228   : > { %2570 = vmatprep.mubr.msk.f32.mxu1 %vm448_vm0, %v749_v56 }
 0x22b   : > { %2571 = vmatmul.mubr.msk.f32.gmra.mxu1 %vm448_vm0, %v817_v57 }
 0x2df   : > { %v2563_v58 = vpop.f32.mrf.mxu1 }
 0x2e1   : > { %v910_v59 = vpop.f32.mrf.mxu1 }
 0x2e3   : > { %v2566_v60 = vpop.f32.mrf.mxu1 }
 0x2e5   : > { %v920_v61 = vpop.f32.mrf.mxu1 }
 0x2e7   : > { %v2569_v62 = vpop.f32.mrf.mxu1 }
 0x2e8   : > { %v1021_v0 = vcombine.low %v2563_v58, %v2569_v62  ;;  %v1022_v1 = vcombine.high %v2563_v58, %v2569_v62 }
 0x2e9   : > { %v930_v2 = vpop.f32.mrf.mxu1 }
 0x2ea   : > { %v1029_v8 = vrot.slane %v1021_v0, %v2899_v9  ;;  %v1036_v10 = vrot.slane %v1022_v1, %v2899_v9  ;;  %v953_v11 = vcombine.low %v910_v59, %v930_v2  ;;  %v954_v12 = vcombine.high %v910_v59, %v930_v2 }
 0x2eb   : > { %v2572_v4 = vpop.f32.mrf.mxu1 }
 0x2ec   : > { %v1037_v6 = vcombine.low %v2566_v60, %v2572_v4  ;;  %v1038_v7 = vcombine.high %v2566_v60, %v2572_v4  ;;  %v961_v23 = vrot.slane %v953_v11, %v2899_v9  ;;  %v968_v24 = vrot.slane %v954_v12, %v2899_v9 }
 0x2ed   : > { %v940_v13 = vpop.f32.mrf.mxu1 }
 0x2ee   : > { %v1045_v14 = vrot.slane %v1037_v6, %v2899_v9  ;;  %v1052_v15 = vrot.slane %v1038_v7, %v2899_v9  ;;  %v969_v16 = vcombine.low %v920_v61, %v940_v13  ;;  %v970_v17 = vcombine.high %v920_v61, %v940_v13 }
 0x2f0   : > { %v1053_v19 = vcombine.low %v1029_v8, %v1045_v14  ;;  %v1054_v20 = vcombine.high %v1029_v8, %v1045_v14  ;;  %v1069_v21 = vcombine.low %v1036_v10, %v1052_v15  ;;  %v1070_v22 = vcombine.high %v1036_v10, %v1052_v15  ;;  %v949_v10 = vld [vmem:[%s3397_s3] sm:$0xff] }
 0x2f1   : > { %v977_v25 = vrot.slane %v969_v16, %v2899_v9  ;;  %v984_v26 = vrot.slane %v970_v17, %v2899_v9  ;;  %2577 = vmatprep.mubr.msk.f32.mxu0 %vm448_vm0, %v949_v10 }
 0x2f2   : > { %v1061_v27 = vrot.slane %v1053_v19, %v2901_v18  ;;  %v1068_v28 = vrot.slane %v1054_v20, %v2901_v18  ;;  %v1077_v29 = vrot.slane %v1069_v21, %v2901_v18  ;;  %v1084_v30 = vrot.slane %v1070_v22, %v2901_v18 }
 0x2f3   : > { %v985_v31 = vcombine.low %v961_v23, %v977_v25  ;;  %v986_v32 = vcombine.high %v961_v23, %v977_v25  ;;  %v1001_v33 = vcombine.low %v968_v24, %v984_v26  ;;  %v1002_v34 = vcombine.high %v968_v24, %v984_v26 }
 0x2f4   : > { %v1157_v35 = vcombine.low %v1061_v27, %v1068_v28  ;;  %v2504_v36 = vcombine.high %v1061_v27, %v1068_v28  ;;  %v1173_v37 = vcombine.low %v1077_v29, %v1084_v30  ;;  %v2505_v38 = vcombine.high %v1077_v29, %v1084_v30 }
 0x2f5   : > { %v993_v39 = vrot.slane %v985_v31, %v2901_v18  ;;  %v1000_v40 = vrot.slane %v986_v32, %v2901_v18  ;;  %v1009_v41 = vrot.slane %v1001_v33, %v2901_v18  ;;  %v1016_v42 = vrot.slane %v1002_v34, %v2901_v18 }
 0x2f6   : > { %v1164_v43 = vrot.slane %v1157_v35, %v2899_v9  ;;  %v1172_v44 = vrot.slane %v2504_v36, %v2899_v9  ;;  %v1180_v45 = vrot.slane %v1173_v37, %v2899_v9  ;;  %v1188_v46 = vrot.slane %v2505_v38, %v2899_v9  ;;  %v950_v35 = vld [vmem:[%s3397_s3 + $0x8] sm:$0xff]  ;;  %v951_v36 = vld [vmem:[%s3397_s3 + $0x10] sm:$0xff]  ;;  %v952_v37 = vld [vmem:[%s3397_s3 + $0x18] sm:$0xff] }
 0x2f7   : > { %v1089_v47 = vcombine.low %v993_v39, %v1000_v40  ;;  %v2502_v48 = vcombine.high %v993_v39, %v1000_v40  ;;  %v1105_v49 = vcombine.low %v1009_v41, %v1016_v42  ;;  %v2503_v50 = vcombine.high %v1009_v41, %v1016_v42 }
 0x2f8   : > { %v1190_v51 = vcombine.high %v1164_v43, %v1172_v44  ;;  %v1206_v52 = vcombine.high %v1180_v45, %v1188_v46  ;;  %v1189_v53 = vcombine.low %v1164_v43, %v1172_v44  ;;  %v1205_v54 = vcombine.low %v1180_v45, %v1188_v46 }
 0x2f9   : > { %v1096_v55 = vrot.slane %v1089_v47, %v2899_v9  ;;  %v1104_v56 = vrot.slane %v2502_v48, %v2899_v9  ;;  %v1112_v57 = vrot.slane %v1105_v49, %v2899_v9  ;;  %v1120_v58 = vrot.slane %v2503_v50, %v2899_v9 }
 0x2fa   : > { %v1204_v59 = vrot.slane %v1190_v51, %v2901_v18  ;;  %v1220_v60 = vrot.slane %v1206_v52, %v2901_v18  ;;  %v1197_v61 = vrot.slane %v1189_v53, %v2901_v18  ;;  %v1213_v62 = vrot.slane %v1205_v54, %v2901_v18 }
 0x2fb   : > { %v1121_v0 = vcombine.low %v1096_v55, %v1104_v56  ;;  %v1137_v1 = vcombine.low %v1112_v57, %v1120_v58  ;;  %v1122_v2 = vcombine.high %v1096_v55, %v1104_v56  ;;  %v1138_v7 = vcombine.high %v1112_v57, %v1120_v58 }
 0x2fc   : > { %v1223_v4 = vcombine.low %v1204_v59, %v1220_v60  ;;  %v1222_v6 = vcombine.high %v1197_v61, %v1213_v62  ;;  %v1221_v8 = vcombine.low %v1197_v61, %v1213_v62  ;;  %v1224_v14 = vcombine.high %v1204_v59, %v1220_v60 }
 0x2fd   : > { %v1129_v11 = vrot.slane %v1121_v0, %v2901_v18  ;;  %v1145_v12 = vrot.slane %v1137_v1, %v2901_v18  ;;  %v1136_v16 = vrot.slane %v1122_v2, %v2901_v18  ;;  %v1152_v17 = vrot.slane %v1138_v7, %v2901_v18 }
 0x2fe   : > { %1237 = vrot.lane.b32.xlu0 %v1223_v4, %s2773_s27  ;;  %1229 = vrot.lane.b32.xlu1 %v1222_v6, %s2774_s10  ;;  %v1256_v21 = vcombine.high %v2951_v63, %v2951_v63  ;;  %v1257_v22 = vcombine.low %v2959_v3, %v2959_v3  ;;  %v1258_v23 = vcombine.high %v2959_v3, %v2959_v3 }
 0x2ff   : > { %v1153_v13 = vcombine.low %v1129_v11, %v1145_v12  ;;  %v1154_v15 = vcombine.high %v1129_v11, %v1145_v12  ;;  %v1156_v19 = vcombine.high %v1136_v16, %v1152_v17  ;;  %v1155_v20 = vcombine.low %v1136_v16, %v1152_v17 }
 0x300   : > { %v1255_v38 = vcombine.low %v2951_v63, %v2951_v63 }
 0x302   : > { %1245 = vrot.lane.b32.xlu0 %v1224_v14, %s2778_s14  ;;  %1227 = vrot.lane.b32.xlu1 %v1154_v15, %s2774_s10 }
 0x306   : > { %1243 = vrot.lane.b32.xlu0 %v1156_v19, %s2778_s14  ;;  %1235 = vrot.lane.b32.xlu1 %v1155_v20, %s2773_s27 }
 0x30a   : > { %1260 = vrot.lane.b32.xlu1 %v1256_v21, %s2774_s10  ;;  %1264 = vrot.lane.b32.xlu0 %v1257_v22, %s2773_s27 }
 0x30e   : > { %1268 = vrot.lane.b32.xlu1 %v1258_v23, %s2778_s14 }
 0x370   : > { %v1238_v24 = vpop.permute.xlu0 %1237  ;;  %v1230_v25 = vpop.permute.xlu1 %1229 }
 0x371   : > { %v1250_v26 = vsel %vm450_vm1, %v1221_v8, %v1230_v25 }
 0x372   : > { %v1252_v29 = vsel %vm454_vm3, %v1250_v26, %v1238_v24 }
 0x374   : > { %v1246_v27 = vpop.permute.xlu0 %1245  ;;  %v1228_v28 = vpop.permute.xlu1 %1227 }
 0x375   : > { %v1254_v30 = vsel %vm458_vm5, %v1252_v29, %v1246_v27  ;;  %v1249_v31 = vsel %vm450_vm1, %v1153_v13, %v1228_v28 }
 0x376   : > { %2573 = vmatprep.subr.mxu0 %v1254_v30 }
 0x377   : > { %2574 = vmatpush3.msra.mxu0 %v1254_v30 }
 0x378   : > { %v1244_v32 = vpop.permute.xlu0 %1243  ;;  %v1236_v33 = vpop.permute.xlu1 %1235 }
 0x379   : > { %v1251_v3 = vsel %vm454_vm3, %v1249_v31, %v1236_v33 }
 0x37a   : > { %v1253_v34 = vsel %vm458_vm5, %v1251_v3, %v1244_v32 }
 0x37b   : > { %2575 = vmatprep.subr.mxu0 %v1253_v34 }
 0x37c   : > { %2576 = vmatpush3.msra.mxu0 %v1253_v34  ;;  %v1261_v39 = vpop.permute.xlu1 %1260  ;;  %v1265_v41 = vpop.permute.xlu0 %1264 }
 0x37d   : > { %2578 = vmatmul.mubr.msk.f32.vlgmr.msra.gmra.mxu0 %vm448_vm0, %v950_v35  ;;  %v1271_v40 = vsel %vm450_vm1, %v1255_v38, %v1261_v39 }
 0x37e   : > { %2580 = vmatprep.mubr.msk.f32.mxu0 %vm448_vm0, %v951_v36  ;;  %v1272_v42 = vsel %vm454_vm3, %v1271_v40, %v1265_v41 }
 0x380   : > { %v1269_v43 = vpop.permute.xlu1 %1268 }
 0x381   : > { %2581 = vmatmul.mubr.msk.f32.gmra.mxu0 %vm448_vm0, %v952_v37  ;;  %v1273_v44 = vsel %vm458_vm5, %v1272_v42, %v1269_v43 }
 0x43d   : > { %v2579_v45 = vpop.f32.mrf.mxu0 }
 0x43e   : > { %v1358_v46 = vadd.f32 %v2579_v45, %v1273_v44 }
 0x43f   : > { %v1352_v47 = vpop.f32.mrf.mxu0 }
 0x440   : > { %v1353_v48 = vadd.f32 %v1352_v47, %v1273_v44  ;;  %1377 = vrot.lane.b32.xlu1 %v1358_v46, %s2778_s14 }
 0x441   : > { %v2582_v63 = vpop.f32.mrf.mxu0 }
 0x442   : > { %1375 = vrot.lane.b32.xlu0 %v1353_v48, %s2778_s14  ;;  %v3125_v50 = vadd.f32 %v2582_v63, %v1273_v44 }
 0x443   : > { %v1362_v49 = vpop.f32.mrf.mxu0 }
 0x444   : > { %1389 = vrot.lane.b32.xlu1 %v1358_v46, %s2773_s27  ;;  %v3128_v51 = vadd.f32 %v1362_v49, %v1273_v44 }
 0x446   : > { %1387 = vrot.lane.b32.xlu0 %v1353_v48, %s2773_s27 }
 0x448   : > { %1401 = vrot.lane.b32.xlu1 %v1358_v46, %s2774_s10 }
 0x44a   : > { %1399 = vrot.lane.b32.xlu0 %v1353_v48, %s2774_s10 }
 0x44c   : > { %1381 = vrot.lane.b32.xlu1 %v3125_v50, %s2778_s14 }
 0x44e   : > { %1379 = vrot.lane.b32.xlu0 %v3128_v51, %s2778_s14 }
 0x450   : > { %1393 = vrot.lane.b32.xlu1 %v3125_v50, %s2773_s27 }
 0x452   : > { %1391 = vrot.lane.b32.xlu0 %v3128_v51, %s2773_s27 }
 0x454   : > { %1405 = vrot.lane.b32.xlu1 %v3125_v50, %s2774_s10 }
 0x456   : > { %1403 = vrot.lane.b32.xlu0 %v3128_v51, %s2774_s10 }
 0x4b2   : > { %v1378_v52 = vpop.permute.xlu1 %1377 }
 0x4b4   : > { %v1376_v53 = vpop.permute.xlu0 %1375 }
 0x4b6   : > { %v1390_v54 = vpop.permute.xlu1 %1389 }
 0x4b7   : > { %v1479_v55 = vcombine.low %v1358_v46, %v1390_v54  ;;  %v1480_v56 = vcombine.high %v1358_v46, %v1390_v54 }
 0x4b8   : > { %v1388_v57 = vpop.permute.xlu0 %1387 }
 0x4b9   : > { %v1487_v61 = vrot.slane %v1479_v55, %v2899_v9  ;;  %v1494_v62 = vrot.slane %v1480_v56, %v2899_v9  ;;  %v1411_v0 = vcombine.low %v1353_v48, %v1388_v57  ;;  %v1412_v1 = vcombine.high %v1353_v48, %v1388_v57 }
 0x4ba   : > { %v1402_v58 = vpop.permute.xlu1 %1401 }
 0x4bb   : > { %v1495_v59 = vcombine.low %v1378_v52, %v1402_v58  ;;  %v1496_v60 = vcombine.high %v1378_v52, %v1402_v58  ;;  %v1419_v15 = vrot.slane %v1411_v0, %v2899_v9  ;;  %v1426_v16 = vrot.slane %v1412_v1, %v2899_v9 }
 0x4bc   : > { %v1400_v2 = vpop.permute.xlu0 %1399 }
 0x4bd   : > { %v1503_v4 = vrot.slane %v1495_v59, %v2899_v9  ;;  %v1510_v6 = vrot.slane %v1496_v60, %v2899_v9  ;;  %v1427_v7 = vcombine.low %v1376_v53, %v1400_v2  ;;  %v1428_v8 = vcombine.high %v1376_v53, %v1400_v2 }
 0x4be   : > { %v1382_v10 = vpop.permute.xlu1 %1381 }
 0x4bf   : > { %v1511_v11 = vcombine.low %v1487_v61, %v1503_v4  ;;  %v1512_v12 = vcombine.high %v1487_v61, %v1503_v4  ;;  %v1527_v13 = vcombine.low %v1494_v62, %v1510_v6  ;;  %v1528_v14 = vcombine.high %v1494_v62, %v1510_v6 }
 0x4c0   : > { %v1435_v17 = vrot.slane %v1427_v7, %v2899_v9  ;;  %v1442_v19 = vrot.slane %v1428_v8, %v2899_v9  ;;  %v1380_v20 = vpop.permute.xlu0 %1379 }
 0x4c1   : > { %v1519_v21 = vrot.slane %v1511_v11, %v2901_v18  ;;  %v1526_v22 = vrot.slane %v1512_v12, %v2901_v18  ;;  %v1535_v23 = vrot.slane %v1527_v13, %v2901_v18  ;;  %v1542_v24 = vrot.slane %v1528_v14, %v2901_v18 }
 0x4c2   : > { %v1443_v25 = vcombine.low %v1419_v15, %v1435_v17  ;;  %v1444_v26 = vcombine.high %v1419_v15, %v1435_v17  ;;  %v1459_v27 = vcombine.low %v1426_v16, %v1442_v19  ;;  %v1460_v28 = vcombine.high %v1426_v16, %v1442_v19  ;;  %v1394_v33 = vpop.permute.xlu1 %1393 }
 0x4c3   : > { %v1751_v29 = vcombine.low %v1519_v21, %v1526_v22  ;;  %v2512_v30 = vcombine.high %v1519_v21, %v1526_v22  ;;  %v1767_v31 = vcombine.low %v1535_v23, %v1542_v24  ;;  %v2513_v32 = vcombine.high %v1535_v23, %v1542_v24 }
 0x4c4   : > { %v1451_v3 = vrot.slane %v1443_v25, %v2901_v18  ;;  %v1458_v34 = vrot.slane %v1444_v26, %v2901_v18  ;;  %v1392_v35 = vpop.permute.xlu0 %1391  ;;  %v1467_v36 = vrot.slane %v1459_v27, %v2901_v18  ;;  %v1474_v37 = vrot.slane %v1460_v28, %v2901_v18 }
 0x4c5   : > { %v1758_v38 = vrot.slane %v1751_v29, %v2899_v9  ;;  %v1766_v39 = vrot.slane %v2512_v30, %v2899_v9  ;;  %v1774_v40 = vrot.slane %v1767_v31, %v2899_v9  ;;  %v1782_v41 = vrot.slane %v2513_v32, %v2899_v9 }
 0x4c6   : > { %v1683_v42 = vcombine.low %v1451_v3, %v1458_v34  ;;  %v2510_v43 = vcombine.high %v1451_v3, %v1458_v34  ;;  %v1699_v44 = vcombine.low %v1467_v36, %v1474_v37  ;;  %v2511_v45 = vcombine.high %v1467_v36, %v1474_v37  ;;  %v1406_v48 = vpop.permute.xlu1 %1405 }
 0x4c7   : > { %v1615_v46 = vcombine.low %v3125_v50, %v1394_v33  ;;  %v1616_v47 = vcombine.high %v3125_v50, %v1394_v33  ;;  %v1783_v49 = vcombine.low %v1758_v38, %v1766_v39  ;;  %v1784_v52 = vcombine.high %v1758_v38, %v1766_v39 }
 0x4c8   : > { %v1404_v63 = vpop.permute.xlu0 %1403  ;;  %v1799_v53 = vcombine.low %v1774_v40, %v1782_v41  ;;  %v1547_v54 = vcombine.low %v3128_v51, %v1392_v35  ;;  %v1800_v55 = vcombine.high %v1774_v40, %v1782_v41  ;;  %v3166_v56 = vrot.slane %v1683_v42, %v2899_v9 }
 0x4c9   : > { %v3169_v57 = vrot.slane %v2510_v43, %v2899_v9  ;;  %v1548_v58 = vcombine.high %v3128_v51, %v1392_v35  ;;  %v1631_v59 = vcombine.low %v1382_v10, %v1406_v48  ;;  %v1632_v60 = vcombine.high %v1382_v10, %v1406_v48 }
 0x4ca   : > { %v1563_v61 = vcombine.low %v1380_v20, %v1404_v63  ;;  %v1564_v50 = vcombine.high %v1380_v20, %v1404_v63  ;;  %v1706_v62 = vrot.slane %v1699_v44, %v2899_v9  ;;  %v1714_v0 = vrot.slane %v2511_v45, %v2899_v9 }
 0x4cb   : > { %v1623_v1 = vrot.slane %v1615_v46, %v2899_v9  ;;  %v1630_v2 = vrot.slane %v1616_v47, %v2899_v9  ;;  %v1555_v4 = vrot.slane %v1547_v54, %v2899_v9  ;;  %v1639_v6 = vrot.slane %v1631_v59, %v2899_v9 }
 0x4cc   : > { %v1646_v7 = vrot.slane %v1632_v60, %v2899_v9  ;;  %v1571_v51 = vrot.slane %v1563_v61, %v2899_v9  ;;  %v1562_v8 = vrot.slane %v1548_v58, %v2899_v9  ;;  %v1578_v10 = vrot.slane %v1564_v50, %v2899_v9 }
 0x4cd   : > { %v1807_v11 = vrot.slane %v1799_v53, %v2901_v18  ;;  %v1814_v12 = vrot.slane %v1800_v55, %v2901_v18  ;;  %v1647_v13 = vcombine.low %v1623_v1, %v1639_v6  ;;  %v1648_v14 = vcombine.high %v1623_v1, %v1639_v6 }
 0x4ce   : > { %v1663_v15 = vcombine.low %v1630_v2, %v1646_v7  ;;  %v1664_v16 = vcombine.high %v1630_v2, %v1646_v7  ;;  %v1579_v17 = vcombine.low %v1555_v4, %v1571_v51  ;;  %v1580_v19 = vcombine.high %v1555_v4, %v1571_v51 }
 0x4cf   : > { %v1791_v20 = vrot.slane %v1783_v49, %v2901_v18  ;;  %v1798_v21 = vrot.slane %v1784_v52, %v2901_v18  ;;  %v1655_v22 = vrot.slane %v1647_v13, %v2901_v18  ;;  %v1662_v23 = vrot.slane %v1648_v14, %v2901_v18 }
 0x4d0   : > { %v1671_v24 = vrot.slane %v1663_v15, %v2901_v18  ;;  %v1678_v25 = vrot.slane %v1664_v16, %v2901_v18  ;;  %v3191_v26 = vrot.slane %v1579_v17, %v2901_v18  ;;  %v3194_v27 = vrot.slane %v1580_v19, %v2901_v18 }
 0x4d1   : > { %v1595_v28 = vcombine.low %v1562_v8, %v1578_v10  ;;  %v1596_v29 = vcombine.high %v1562_v8, %v1578_v10  ;;  %v1887_v30 = vcombine.low %v1655_v22, %v1662_v23  ;;  %v2516_v31 = vcombine.high %v1655_v22, %v1662_v23 }
 0x4d2   : > { %v1903_v32 = vcombine.low %v1671_v24, %v1678_v25  ;;  %v2517_v33 = vcombine.high %v1671_v24, %v1678_v25  ;;  %v2523_v3 = vcombine.low %v1807_v11, %v1814_v12  ;;  %v2525_v34 = vcombine.high %v1807_v11, %v1814_v12 }
 0x4d3   : > { %v2522_v35 = vcombine.low %v1791_v20, %v1798_v21  ;;  %v2524_v36 = vcombine.high %v1791_v20, %v1798_v21  ;;  %v1894_v37 = vrot.slane %v1887_v30, %v2899_v9  ;;  %v1902_v38 = vrot.slane %v2516_v31, %v2899_v9 }
 0x4d4   : > { %v1910_v39 = vrot.slane %v1903_v32, %v2899_v9  ;;  %v1918_v40 = vrot.slane %v2517_v33, %v2899_v9  ;;  %v1715_v41 = vcombine.low %v3166_v56, %v3169_v57  ;;  %v1716_v42 = vcombine.high %v3166_v56, %v3169_v57 }
 0x4d5   : > { %v1731_v43 = vcombine.low %v1706_v62, %v1714_v0  ;;  %v1732_v44 = vcombine.high %v1706_v62, %v1714_v0  ;;  %v1603_v45 = vrot.slane %v1595_v28, %v2901_v18  ;;  %v1610_v46 = vrot.slane %v1596_v29, %v2901_v18 }
 0x4d6   : > { %v1819_v47 = vcombine.low %v3191_v26, %v3194_v27  ;;  %v2514_v48 = vcombine.high %v3191_v26, %v3194_v27  ;;  %v1919_v63 = vcombine.low %v1894_v37, %v1902_v38  ;;  %v1920_v49 = vcombine.high %v1894_v37, %v1902_v38 }
 0x4d7   : > { %v1935_v52 = vcombine.low %v1910_v39, %v1918_v40  ;;  %v1936_v53 = vcombine.high %v1910_v39, %v1918_v40  ;;  %v2038_v54 = vrot.slane %v2523_v3, %v2899_v9  ;;  %v2054_v55 = vrot.slane %v2525_v34, %v2899_v9 }
 0x4d8   : > { %v2031_v56 = vrot.slane %v2522_v35, %v2899_v9  ;;  %v2047_v57 = vrot.slane %v2524_v36, %v2899_v9  ;;  %v1739_v58 = vrot.slane %v1731_v43, %v2901_v18  ;;  %v1746_v59 = vrot.slane %v1732_v44, %v2901_v18 }
 0x4d9   : > { %v1723_v60 = vrot.slane %v1715_v41, %v2901_v18  ;;  %v1730_v61 = vrot.slane %v1716_v42, %v2901_v18  ;;  %v2072_v50 = vcombine.high %v2038_v54, %v2054_v55  ;;  %v2071_v0 = vcombine.low %v2038_v54, %v2054_v55 }
 0x4da   : > { %v2056_v62 = vcombine.high %v2031_v56, %v2047_v57  ;;  %v2055_v1 = vcombine.low %v2031_v56, %v2047_v57  ;;  %v2519_v2 = vcombine.low %v1739_v58, %v1746_v59  ;;  %v2521_v4 = vcombine.high %v1739_v58, %v1746_v59 }
 0x4db   : > { %v2518_v6 = vcombine.low %v1723_v60, %v1730_v61  ;;  %v2520_v7 = vcombine.high %v1723_v60, %v1730_v61  ;;  %v2086_v51 = vrot.slane %v2072_v50, %v2901_v18  ;;  %v3221_v10 = vrot.slane %v2071_v0, %v2901_v18 }
 0x4dc   : > { %v2070_v8 = vrot.slane %v2056_v62, %v2901_v18  ;;  %v3224_v11 = vrot.slane %v2055_v1, %v2901_v18  ;;  %v1970_v12 = vrot.slane %v2519_v2, %v2899_v9  ;;  %v1986_v13 = vrot.slane %v2521_v4, %v2899_v9 }
 0x4dd   : > { %v1963_v14 = vrot.slane %v2518_v6, %v2899_v9  ;;  %v1979_v15 = vrot.slane %v2520_v7, %v2899_v9  ;;  %v1835_v16 = vcombine.low %v1603_v45, %v1610_v46  ;;  %v2515_v17 = vcombine.high %v1603_v45, %v1610_v46  ;;  %2268 = vrot.lane.b32.xlu1 %v2086_v51, %s2773_s27 }
 0x4de   : > { %2256 = vrot.lane.b32.xlu0 %v2070_v8, %s2773_s27  ;;  %v2089_v19 = vcombine.high %v3221_v10, %v2772_v5  ;;  %v2004_v20 = vcombine.high %v1970_v12, %v1986_v13  ;;  %v2087_v22 = vcombine.high %v3224_v11, %v2772_v5  ;;  %v1943_v23 = vrot.slane %v1935_v52, %v2901_v18 }
 0x4df   : > { %v1988_v21 = vcombine.high %v1963_v14, %v1979_v15  ;;  %v1950_v24 = vrot.slane %v1936_v53, %v2901_v18  ;;  %v1927_v25 = vrot.slane %v1919_v63, %v2901_v18  ;;  %v1826_v26 = vrot.slane %v1819_v47, %v2899_v9 }
 0x4e0   : > { %v1834_v27 = vrot.slane %v2514_v48, %v2899_v9  ;;  %v1934_v28 = vrot.slane %v1920_v49, %v2901_v18  ;;  %v1842_v29 = vrot.slane %v1835_v16, %v2899_v9  ;;  %v1850_v30 = vrot.slane %v2515_v17, %v2899_v9 }
 0x4e1   : > { %2264 = vrot.lane.b32.xlu1 %v2089_v19, %s2774_s10  ;;  %v2018_v31 = vrot.slane %v2004_v20, %v2901_v18  ;;  %v2002_v32 = vrot.slane %v1988_v21, %v2901_v18  ;;  %v2003_v33 = vcombine.low %v1970_v12, %v1986_v13  ;;  %v1987_v3 = vcombine.low %v1963_v14, %v1979_v15 }
 0x4e2   : > { %2252 = vrot.lane.b32.xlu0 %v2087_v22, %s2774_s10  ;;  %v2531_v34 = vcombine.low %v1943_v23, %v1950_v24  ;;  %v2533_v35 = vcombine.high %v1943_v23, %v1950_v24  ;;  %v2530_v36 = vcombine.low %v1927_v25, %v1934_v28  ;;  %v2532_v37 = vcombine.high %v1927_v25, %v1934_v28 }
 0x4e3   : > { %v1851_v38 = vcombine.low %v1826_v26, %v1834_v27  ;;  %v1852_v39 = vcombine.high %v1826_v26, %v1834_v27  ;;  %v1867_v40 = vcombine.low %v1842_v29, %v1850_v30  ;;  %v1868_v41 = vcombine.high %v1842_v29, %v1850_v30 }
 0x4e4   : > { %v2090_v42 = vcombine.high %v2086_v51, %v2772_v5  ;;  %v2088_v43 = vcombine.high %v2070_v8, %v2772_v5  ;;  %v3253_v44 = vrot.slane %v2003_v33, %v2901_v18  ;;  %v3256_v45 = vrot.slane %v1987_v3, %v2901_v18 }
 0x4e5   : > { %2244 = vrot.lane.b32.xlu1 %v2018_v31, %s2773_s27  ;;  %v2174_v46 = vrot.slane %v2531_v34, %v2899_v9  ;;  %v2190_v47 = vrot.slane %v2533_v35, %v2899_v9  ;;  %v2167_v48 = vrot.slane %v2530_v36, %v2899_v9  ;;  %v2183_v63 = vrot.slane %v2532_v37, %v2899_v9 }
 0x4e6   : > { %2232 = vrot.lane.b32.xlu0 %v2002_v32, %s2773_s27  ;;  %v2021_v49 = vcombine.high %v3253_v44, %v2772_v5  ;;  %v2019_v52 = vcombine.high %v3256_v45, %v2772_v5  ;;  %v1875_v53 = vrot.slane %v1867_v40, %v2901_v18  ;;  %v1882_v54 = vrot.slane %v1868_v41, %v2901_v18 }
 0x4e7   : > { %v2208_v55 = vcombine.high %v2174_v46, %v2190_v47  ;;  %v2192_v56 = vcombine.high %v2167_v48, %v2183_v63  ;;  %v1859_v57 = vrot.slane %v1851_v38, %v2901_v18  ;;  %v1866_v58 = vrot.slane %v1852_v39, %v2901_v18 }
 0x4e8   : > { %v2207_v59 = vcombine.low %v2174_v46, %v2190_v47  ;;  %v2191_v60 = vcombine.low %v2167_v48, %v2183_v63  ;;  %v2527_v61 = vcombine.low %v1875_v53, %v1882_v54  ;;  %v2529_v50 = vcombine.high %v1875_v53, %v1882_v54 }
 0x4e9   : > { %2272 = vrot.lane.b32.xlu1 %v2090_v42, %s2778_s14  ;;  %v2222_v62 = vrot.slane %v2208_v55, %v2901_v18  ;;  %v2206_v0 = vrot.slane %v2192_v56, %v2901_v18  ;;  %v2526_v1 = vcombine.low %v1859_v57, %v1866_v58  ;;  %v2528_v2 = vcombine.high %v1859_v57, %v1866_v58 }
 0x4ea   : > { %2260 = vrot.lane.b32.xlu0 %v2088_v43, %s2778_s14  ;;  %v2022_v4 = vcombine.high %v2018_v31, %v2772_v5  ;;  %v2020_v6 = vcombine.high %v2002_v32, %v2772_v5  ;;  %v3281_v7 = vrot.slane %v2207_v59, %v2901_v18  ;;  %v3284_v51 = vrot.slane %v2191_v60, %v2901_v18 }
 0x4eb   : > { %v2106_v8 = vrot.slane %v2527_v61, %v2899_v9  ;;  %v2122_v12 = vrot.slane %v2529_v50, %v2899_v9  ;;  %v2099_v13 = vrot.slane %v2526_v1, %v2899_v9  ;;  %v2115_v14 = vrot.slane %v2528_v2, %v2899_v9 }
 0x4ec   : > { %v2225_v15 = vcombine.high %v3281_v7, %v2772_v5  ;;  %v2223_v16 = vcombine.high %v3284_v51, %v2772_v5  ;;  %v2224_v29 = vcombine.high %v2206_v0, %v2772_v5 }
 0x4ed   : > { %2240 = vrot.lane.b32.xlu1 %v2021_v49, %s2774_s10  ;;  %v2140_v17 = vcombine.high %v2106_v8, %v2122_v12  ;;  %v2124_v19 = vcombine.high %v2099_v13, %v2115_v14  ;;  %v2139_v20 = vcombine.low %v2106_v8, %v2122_v12  ;;  %v2123_v21 = vcombine.low %v2099_v13, %v2115_v14 }
 0x4ee   : > { %2228 = vrot.lane.b32.xlu0 %v2019_v52, %s2774_s10 }
 0x4ef   : > { %v2154_v9 = vrot.slane %v2140_v17, %v2901_v18  ;;  %v2138_v22 = vrot.slane %v2124_v19, %v2901_v18  ;;  %v2147_v23 = vrot.slane %v2139_v20, %v2901_v18  ;;  %v2131_v24 = vrot.slane %v2123_v21, %v2901_v18 }
 0x4f0   : > { %v2226_v18 = vcombine.high %v2222_v62, %v2772_v5 }
 0x4f1   : > { %2316 = vrot.lane.b32.xlu1 %v2222_v62, %s2773_s27  ;;  %v2157_v25 = vcombine.high %v2147_v23, %v2772_v5  ;;  %v2155_v26 = vcombine.high %v2131_v24, %v2772_v5  ;;  %v2158_v27 = vcombine.high %v2154_v9, %v2772_v5  ;;  %v2156_v28 = vcombine.high %v2138_v22, %v2772_v5 }
 0x4f2   : > { %2304 = vrot.lane.b32.xlu0 %v2206_v0, %s2773_s27 }
 0x4f5   : > { %2248 = vrot.lane.b32.xlu1 %v2022_v4, %s2778_s14 }
 0x4f6   : > { %2236 = vrot.lane.b32.xlu0 %v2020_v6, %s2778_s14 }
 0x4f9   : > { %2312 = vrot.lane.b32.xlu1 %v2225_v15, %s2774_s10 }
 0x4fa   : > { %2300 = vrot.lane.b32.xlu0 %v2223_v16, %s2774_s10 }
 0x4fd   : > { %2292 = vrot.lane.b32.xlu1 %v2154_v9, %s2773_s27 }
 0x4fe   : > { %2280 = vrot.lane.b32.xlu0 %v2138_v22, %s2773_s27  ;;  %s2490_s27 = sshll.u32 %s2890_s6, 5 }
 0x501   : > { %2288 = vrot.lane.b32.xlu1 %v2157_v25, %s2774_s10 }
 0x502   : > { %2276 = vrot.lane.b32.xlu0 %v2155_v26, %s2774_s10  ;;  %s3325_s10 = scalar_lea.vmem [#allocation5], %s2490_s27 }
 0x503   : > { %s2384_s26 = sshll.u32 %s3325_s10, 4  ;;  %s2385_s26 = int_to_ptr.vmem [resolvable:$true] %s2384_s26 }
 0x504   : > { %s2685_s8 = scalar_lea.vmem %s2385_s26, 512  ;;  %p2692_p1 = scmp.lt.s32.totalorder %s2385_s26, %s2690_s11 }
 0x505   : > { %2296 = vrot.lane.b32.xlu1 %v2158_v27, %s2778_s14  ;;  %p2686_p8 = scmp.ne.s32.totalorder %s2385_s26, %s2685_s8  ;;  %p2693_p3 = scmp.lt.s32.totalorder %s2691_s12, %s2685_s8 }
 0x506   : > { %2284 = vrot.lane.b32.xlu0 %v2156_v28, %s2778_s14 }
 0x507   : > { %p2687_p12 = pnand %p2686_p8, %p2857_p9  ;;  %p2694_p5 = por %p2693_p3, %p2692_p1 }
 0x509   : > { %2320 = vrot.lane.b32.xlu1 %v2226_v18, %s2778_s14  ;;  %p2688_p0 = pneg %p2687_p12 }
 0x50a   : > { %2308 = vrot.lane.b32.xlu0 %v2224_v29, %s2778_s14  ;;  %s2540_s14 = sshll.u32 %s2757_s18, 9  ;;  %s2368_s18 = scalar_lea.sflag [#allocation4], %s2890_s6 }
 0x50b   : > { %s2382_s7 = scalar_lea.hbm %s3398_s4, %s2540_s14  ;;  %p2695_p6 = pnand %p2694_p5, %p2688_p0 }
 0x54f   : > { %v2269_v30 = vpop.permute.xlu1 %2268 }
 0x550   : > { %v2257_v31 = vpop.permute.xlu0 %2256 }
 0x553   : > { %v2265_v32 = vpop.permute.xlu1 %2264 }
 0x554   : > { %v2253_v33 = vpop.permute.xlu0 %2252  ;;  %v2332_v35 = vsel %vm450_vm1, %v3221_v10, %v2265_v32 }
 0x555   : > { %v2329_v36 = vsel %vm450_vm1, %v3224_v11, %v2253_v33  ;;  %v2333_v37 = vsel %vm454_vm3, %v2332_v35, %v2269_v30 }
 0x556   : > { %v2330_v38 = vsel %vm454_vm3, %v2329_v36, %v2257_v31 }
 0x557   : > { %v2245_v3 = vpop.permute.xlu1 %2244 }
 0x558   : > { %v2233_v34 = vpop.permute.xlu0 %2232 }
 0x55b   : > { %v2273_v5 = vpop.permute.xlu1 %2272 }
 0x55c   : > { %v2261_v39 = vpop.permute.xlu0 %2260  ;;  %v2334_v40 = vsel %vm458_vm5, %v2333_v37, %v2273_v5 }
 0x55d   : > { %v2331_v41 = vsel %vm458_vm5, %v2330_v38, %v2261_v39 }
 0x55e   : > { %v2356_v42 = vcombine.low %v2331_v41, %v2334_v40 }
 0x55f   : > { %v2241_v10 = vpop.permute.xlu1 %2240 }
 0x560   : > { %2364 = vst [vmem:[%s3325_s10 + $0x8] sm:$0xff] %v2356_v42  ;;  %v2229_v43 = vpop.permute.xlu0 %2228  ;;  %v2326_v47 = vsel %vm450_vm1, %v3253_v44, %v2241_v10 }
 0x561   : > { %v2323_v48 = vsel %vm450_vm1, %v3256_v45, %v2229_v43  ;;  %v2327_v63 = vsel %vm454_vm3, %v2326_v47, %v2245_v3 }
 0x562   : > { %v2324_v52 = vsel %vm454_vm3, %v2323_v48, %v2233_v34 }
 0x563   : > { %v2317_v11 = vpop.permute.xlu1 %2316 }
 0x564   : > { %v2305_v46 = vpop.permute.xlu0 %2304 }
 0x567   : > { %v2249_v49 = vpop.permute.xlu1 %2248 }
 0x568   : > { %v2237_v53 = vpop.permute.xlu0 %2236  ;;  %v2328_v54 = vsel %vm458_vm5, %v2327_v63, %v2249_v49 }
 0x569   : > { %v2325_v55 = vsel %vm458_vm5, %v2324_v52, %v2237_v53 }
 0x56a   : > { %v2355_v56 = vcombine.low %v2325_v55, %v2328_v54 }
 0x56b   : > { %v2313_v57 = vpop.permute.xlu1 %2312 }
 0x56c   : > { %2363 = vst [vmem:[%s3325_s10] sm:$0xff] %v2355_v56  ;;  %v2301_v58 = vpop.permute.xlu0 %2300  ;;  %v2344_v4 = vsel %vm450_vm1, %v3281_v7, %v2313_v57 }
 0x56d   : > { %v2341_v6 = vsel %vm450_vm1, %v3284_v51, %v2301_v58  ;;  %v2345_v14 = vsel %vm454_vm3, %v2344_v4, %v2317_v11 }
 0x56e   : > { %v2342_v16 = vsel %vm454_vm3, %v2341_v6, %v2305_v46 }
 0x56f   : > { %v2293_v59 = vpop.permute.xlu1 %2292 }
 0x570   : > { %v2281_v44 = vpop.permute.xlu0 %2280 }
 0x573   : > { %v2289_v45 = vpop.permute.xlu1 %2288 }
 0x574   : > { %v2277_v60 = vpop.permute.xlu0 %2276  ;;  %v2338_v61 = vsel %vm450_vm1, %v2147_v23, %v2289_v45 }
 0x575   : > { %v2335_v50 = vsel %vm450_vm1, %v2131_v24, %v2277_v60  ;;  %v2339_v62 = vsel %vm454_vm3, %v2338_v61, %v2293_v59 }
 0x576   : > { %v2336_v1 = vsel %vm454_vm3, %v2335_v50, %v2281_v44 }
 0x577   : > { %v2297_v0 = vpop.permute.xlu1 %2296 }
 0x578   : > { %v2285_v2 = vpop.permute.xlu0 %2284  ;;  %v2340_v8 = vsel %vm458_vm5, %v2339_v62, %v2297_v0 }
 0x579   : > { %v2337_v12 = vsel %vm458_vm5, %v2336_v1, %v2285_v2 }
 0x57a   : > { %v2357_v13 = vcombine.low %v2337_v12, %v2340_v8 }
 0x57b   : > { %v2321_v15 = vpop.permute.xlu1 %2320 }
 0x57c   : > { %2365 = vst [vmem:[%s3325_s10 + $0x10] sm:$0xff] %v2357_v13  ;;  %v2309_v7 = vpop.permute.xlu0 %2308  ;;  %v2346_v17 = vsel %vm458_vm5, %v2345_v14, %v2321_v15 }
 0x57d   : > { %v2343_v51 = vsel %vm458_vm5, %v2342_v16, %v2309_v7 }
 0x57e   : > { %v2358_v19 = vcombine.low %v2343_v51, %v2346_v17 }
 0x580   : > { %2366 = vst [vmem:[%s3325_s10 + $0x18] sm:$0xff] %v2358_v19 }
 0x581   : > { %2698 = shalt.err (!%p2695_p6)
}
 0x582   : > { %s2699_s13 = scalar_lea.hbm %s2382_s7, 512  ;;  %s2703_s22 = scalar_lea.hbm %s3398_s4, 1024 }
 0x583   : > { %p2700_p7 = scmp.ne.s32.totalorder %s2382_s7, %s2699_s13  ;;  %p2704_p13 = scmp.lt.s32.totalorder %s2382_s7, %s3398_s4 }
 0x584   : > { %p2705_p2 = scmp.lt.s32.totalorder %s2703_s22, %s2699_s13 }
 0x585   : > { %p2701_p10 = pnand %p2700_p7, %p2857_p9 }
 0x586   : > { %p2706_p8 = por %p2705_p2, %p2704_p13 }
 0x587   : > { %p2702_p4 = pneg %p2701_p10 }
 0x589   : > { %p2707_p12 = pnand %p2706_p8, %p2702_p4 }
 0x58b   : > { %2710 = shalt.err (!%p2707_p12)
}
 0x58c   : > { %2585 = dma.vmem_to_hbm [thread:$0]  (%p2857_p9), %s2385_s26, 512, %s2382_s7, %s2368_s18  }
 0x58d PF: > { %s2396_s10 = sand.u32 1, %s2745_s15   ;;  %p3404_p0 = scmp.ge.s32.totalorder %s2765_s20, 2 }
 0x58e   : > { %s2397_s14 = scalar_lea.sflag [#allocation4], %s2396_s10 }
 0x58f   : > { %p2592_p1 = pnand %p3404_p0, %p2864_p11 }
 0x591   : > { %p2593_p3 = pneg %p2592_p1 }
 0x593   : > { %2740 = dma.done.wait (%p2593_p3), %s2397_s14, 512  }
 0x594   : > { %2742 = vsyncadd (%p2593_p3), %s2397_s14, 4294966784  ;;  %s20_s20 = sadd.s32 1, %s2765_s20   ;;  %s3405_s15 = smov %s2749_s16 }
 0x595   : > { %p17_p5 = scmp.ge.s32.totalorder %s20_s20, 4   ;;  %s3406_s16 = smov %s2753_s17 }
 0x596   : > { %s3407_s17 = smov %s2862_s29  ;;  %s3408_s18 = smov %s2761_s19 }
 0x597   : > { %s3409_s19 = smov %s3411_s23  ;;  %19 = sbr.rel (!%p17_p5) target bundleno = 6 (0x6), region = 84 }
 0x59c   :  { %2402 = vsyncpa [#allocation3], 1 }
 0x59d   :  { %2404 = vsyncpa [#allocation3 + $0x1], 1 }
 0x59e   :  { %2405 = vsyncpa [#allocation4], 1 }
 0x59f   :  { %2407 = vsyncpa [#allocation4 + $0x1], 1 }

</bundles_post_ra>
